<compile_context>
chip_gen: v6e
topology: v6e:2x2x1
jax: 0.10.0
libtpu: 0.0.40
codegen_flags: <defaults>
</compile_context>

<pallas_src>
import functools

import jax
import jax.numpy as jnp
from jax.experimental import pallas as pl
from jax.experimental.pallas import tpu as pltpu


_LANE = 128
_SUBLANE = 8
_MAX_COLS = 2048                       # lane-dense width cap (multiple of 128)
_TILE_BYTES_BUDGET = 4 * 1024 * 1024   # per buffer; x4 (2 bufs, in+out) = 16 MiB


def _copy_kernel(x_ref, o_ref):
    # Pure copy: in/out block shapes are identical, so this is straight
    # DMA-in -> DMA-out with no lane/sublane relayout.
    o_ref[...] = x_ref[...]


def _reshaper_impl(x, n):
    B, T, C = x.shape
    assert T % n == 0, "T must be divisible by n (torch .view would fail too)"
    t_out, c_out = T // n, C * n
    final_shape = (B, c_out) if t_out == 1 else (B, t_out, c_out)

    total = B * T * C
    itemsize = jnp.dtype(x.dtype).itemsize

    # --- Lane-dense path: flatten to (rows, cols) with cols a large multiple
    # of 128 that divides the element count.  Element order is unchanged, so
    # this reproduces torch .view semantics exactly.
    cols = None
    for cand in (_MAX_COLS, 1024, 512, 256, _LANE):
        if total % cand == 0:
            cols = cand
            break

    if cols is not None:
        rows = total // cols
        x2 = x.reshape(rows, cols)  # zero-cost metadata reshape (bitcast)

        if rows <= _SUBLANE:
            row_block = rows  # full extent -> (8,128) rule satisfied
        else:
            max_rows_by_budget = max(_SUBLANE,
                                     _TILE_BYTES_BUDGET // (cols * itemsize))
            row_block = min(rows, max_rows_by_budget)
            row_block = max(_SUBLANE, (row_block // _SUBLANE) * _SUBLANE)

        grid = (pl.cdiv(rows, row_block),)

        out2d = pl.pallas_call(
            _copy_kernel,
            out_shape=jax.ShapeDtypeStruct((rows, cols), x.dtype),
            grid_spec=pltpu.PrefetchScalarGridSpec(
                num_scalar_prefetch=0,
                grid=grid,
                in_specs=[pl.BlockSpec((row_block, cols), lambda i: (i, 0))],
                out_specs=pl.BlockSpec((row_block, cols), lambda i: (i, 0)),
            ),
            compiler_params=pltpu.CompilerParams(
                dimension_semantics=("parallel",),
                vmem_limit_bytes=32 * 1024 * 1024,
            ),
        )(x2)
        return out2d.reshape(final_shape)

    # --- Fallback (total not a multiple of 128): reshape in the wrapper and
    # copy full-extent per-batch blocks (still no in-kernel relayout).
    x3 = x.reshape(B, t_out, c_out)
    out = pl.pallas_call(
        _copy_kernel,
        out_shape=jax.ShapeDtypeStruct((B, t_out, c_out), x.dtype),
        grid_spec=pltpu.PrefetchScalarGridSpec(
            num_scalar_prefetch=0,
            grid=(B,),
            in_specs=[pl.BlockSpec((1, t_out, c_out), lambda b: (b, 0, 0))],
            out_specs=pl.BlockSpec((1, t_out, c_out), lambda b: (b, 0, 0)),
        ),
        compiler_params=pltpu.CompilerParams(
            dimension_semantics=("parallel",)),
    )(x3)
    return out.reshape(final_shape)


# jit with static n so the surrounding reshapes stay zero-cost bitcasts.
reshaper = jax.jit(_reshaper_impl, static_argnums=(1,))


if __name__ == "__main__":
    key = jax.random.PRNGKey(0)

    # Case 1: small shape, T//n > 1 -> output (B, T//n, C*n)
    B, T, C, n = 2, 8, 32, 2
    x = jax.random.normal(key, (B, T, C), dtype=jnp.float32)
    y = jax.block_until_ready(reshaper(x, n))
    y_ref = x.reshape(B, T // n, C * n)
    assert y.shape == (B, T // n, C * n)
    assert jnp.array_equal(y, y_ref), "mismatch vs reference reshape"

    # Case 2: n == T -> T//n == 1 -> squeeze branch, output (B, C*T)
    y2 = jax.block_until_ready(reshaper(x, T))
    y2_ref = x.reshape(B, C * T)
    assert y2.shape == (B, C * T)
    assert jnp.array_equal(y2, y2_ref), "mismatch vs reference reshape (squeeze)"

    # Case 3: moderate shape exercising the lane-dense tiled path with a
    # partial trailing row block (rows=12, row_block=8, grid=2).
    B3, T3, C3, n3 = 4, 64, 96, 4
    x3 = jax.random.normal(jax.random.PRNGKey(0), (B3, T3, C3), jnp.float32)
    y3 = jax.block_until_ready(reshaper(x3, n3))
    y3_ref = x3.reshape(B3, T3 // n3, C3 * n3)
    assert jnp.array_equal(y3, y3_ref), "mismatch vs reference reshape (tiled)"

    # Case 4: fallback path (total elements not a multiple of 128).
    B4, T4, C4, n4 = 2, 6, 10, 3
    x4 = jax.random.normal(jax.random.PRNGKey(0), (B4, T4, C4), jnp.float32)
    y4 = jax.block_until_ready(reshaper(x4, n4))
    y4_ref = x4.reshape(B4, T4 // n4, C4 * n4)
    assert jnp.array_equal(y4, y4_ref), "mismatch vs reference reshape (fallback)"

    print("KERNEL_OK")
</pallas_src>

<mosaic_0001>
module attributes {stable_mosaic.version = 11 : i64} {
  func.func @_copy_kernel(%arg0: i32, %arg1: memref<1x512xf32, #tpu.memory_space<vmem>>, %arg2: memref<1x512xf32, #tpu.memory_space<vmem>>) attributes {dimension_semantics = [#tpu.dimension_semantics<parallel>], iteration_bounds = array<i64: 1>, scalar_prefetch = 0 : i64, scratch_operands = 0 : i64, tpu.core_type = #tpu.core_type<tc>, window_params = [{transform_indices = @transform_0, window_bounds = array<i64: 1, 512>}, {transform_indices = @transform_1, window_bounds = array<i64: 1, 512>}]} {
    %c0 = arith.constant 0 : index
    %c0_0 = arith.constant 0 : index
    %0 = vector.load %arg1[%c0, %c0_0] : memref<1x512xf32, #tpu.memory_space<vmem>>, vector<1x512xf32>
    %c0_1 = arith.constant 0 : index
    %c0_2 = arith.constant 0 : index
    %1 = vector.load %arg2[%c0_1, %c0_2] : memref<1x512xf32, #tpu.memory_space<vmem>>, vector<1x512xf32>
    tpu.vector_store %arg2[%c0_1, %c0_2], %0 {strides = array<i32>} : memref<1x512xf32, #tpu.memory_space<vmem>>, vector<1x512xf32>,
    return
  }
  func.func @transform_0(%arg0: i32) -> (i32, i32) {
    %c0_i32 = arith.constant 0 : i32
    %c0_i32_0 = arith.constant 0 : i32
    return %arg0, %c0_i32 : i32, i32
  }
  func.func @transform_1(%arg0: i32) -> (i32, i32) {
    %c0_i32 = arith.constant 0 : i32
    %c0_i32_0 = arith.constant 0 : i32
    return %arg0, %c0_i32 : i32, i32
  }
}

</mosaic_0001>

<bundles_post_ra>
// kernel: _reshaper_impl.1
= control target key start
LH: loop header
LB: loop body
LE: loop exit
PB: predicated region body
PF: predicated region fallthrough
CT: control target
= control target key end

     0   :  { %v9_v0 = vlaneseq  ;;  %s34_s0 = inlined_call_operand.vmem [shape: f32[1,512], index: 0, kind: input, shape index: {}]   ;;  %s35_s1 = inlined_call_operand.vmem [shape: f32[1,512], index: 1, kind: output, shape index: {}]  }
   0x1   :  { %v8_v1 = vld [vmem:[%s34_s0] sm:$0xf] }
   0x2   :  { %vm11_vm0 = vcmp.lt.s32.totalorder %v9_v0, 512 }
   0x3   :  { %13 = vst.msk [vmem:[%s35_s1] sm:$0xf] %vm11_vm0, %v8_v1 }

</bundles_post_ra>
